<compile_context>
chip_gen: v5e
topology: v5e:2x2
jax: 0.10.0
libtpu: 0.0.40
codegen_flags: <defaults>
</compile_context>

<pallas_src>
import functools

import jax
import jax.numpy as jnp
from jax import lax
from jax.experimental import pallas as pl
from jax.experimental.pallas import tpu as pltpu

LANE = 128
DEFAULT_TILE_N = 512          # lane tile over samples (>=512 ~ HBM roofline)


def _round_up(x, m):
    return ((x + m - 1) // m) * m


def _bce_with_logits(s, y):
    # Numerically-stable binary_cross_entropy_with_logits, reduction='none'.
    # Note: ce == -log(p_t), p_t = prob assigned to the true class.
    return jnp.maximum(s, 0.0) - s * y + jnp.log1p(jnp.exp(-jnp.abs(s)))


def _pow_gamma(x, gamma):
    # (1 - p_t) ** gamma. For small integer gamma (common case gamma=2) use
    # repeated VPU multiplies instead of exp(gamma*log(x)) (2 EUP ops + log(0)
    # hazard when p_t saturates to 1).
    if float(gamma).is_integer() and 0 <= gamma <= 8:
        g = int(gamma)
        if g == 0:
            return jnp.ones_like(x)
        out = x
        for _ in range(g - 1):
            out = out * x
        return out
    return jnp.exp(gamma * jnp.log(jnp.maximum(x, 1e-30)))


# ---------------------------------------------------------------------------
# Fused evaluator kernel (score model + Focal/CE/L2 loss, per-batch reduction)
# ---------------------------------------------------------------------------

def fused_eval_kernel(counts_smem, feats_ref, w_ref, b_ref, labels_ref,
                      logits_ref, loss_ref, acc_ref, *,
                      loss_type, alpha, gamma, scale, reduction):
    """Grid (B, N_pad // TN): batch rows "parallel", sample tiles = reduction.

    counts_smem : (B,)         i32 SMEM  true #samples per batch (scalar prefetch)
    feats_ref   : (1, D, TN)   bf16 VMEM features, SAMPLES on the lane axis
    w_ref       : (1, D, 1)    f32 VMEM  score-model weight
    b_ref       : (1, 1)       f32 VMEM  score-model bias
    labels_ref  : (1, 1, TN)   f32 VMEM  binary labels (zero padded)
    logits_ref  : (1, 1, TN)   f32 out   classification logits (for AUROC)
    loss_ref    : (1, 1, LANE) f32 out   per-batch reduced loss (lane broadcast)
    acc_ref     : (1, TN)      f32 VMEM  per-lane partial loss sums (scratch)
    """
    b = pl.program_id(0)
    j = pl.program_id(1)
    nj = pl.num_programs(1)

    @pl.when(j == 0)
    def _():
        acc_ref[...] = jnp.zeros_like(acc_ref)

    # Fused score model: logits = sum_d feats*w + b.  D on sublanes / samples
    # on lanes -> cross-vreg VALU adds + one 8-sublane XLU reduce per column.
    f = feats_ref[0].astype(jnp.float32)                               # (D, TN)
    s = jnp.sum(f * w_ref[0], axis=0, keepdims=True) + b_ref[...]      # (1, TN)
    logits_ref[0] = s

    y = labels_ref[0]                                                  # (1, TN)

    # Per-element loss, reduction='none'.
    if loss_type == 'FocalLoss':
        ce = _bce_with_logits(s, y)
        p_t = jnp.exp(-ce)            # reuse ce == -log(p_t); no second sigmoid
        loss_elem = ce * _pow_gamma(1.0 - p_t, gamma)
        if alpha >= 0:
            loss_elem = (alpha * y + (1.0 - alpha) * (1.0 - y)) * loss_elem
    elif loss_type == 'CEloss':
        loss_elem = _bce_with_logits(s, y)
    elif loss_type == 'L2loss':
        p = jax.nn.sigmoid(s)
        loss_elem = (p - y) ** 2
    else:
        raise ValueError(loss_type)

    # Mask padded lanes of this tile; accumulate per-lane partial sums.
    tn = s.shape[-1]
    col = j * tn + lax.broadcasted_iota(jnp.int32, s.shape, 1)         # (1, TN)
    valid = col < counts_smem[b]
    acc_ref[...] += jnp.where(valid, loss_elem, 0.0)

    @pl.when(j == nj - 1)
    def _():
        total = jnp.sum(acc_ref[...], axis=-1, keepdims=True)          # (1, 1)
        if reduction == 'mean':
            total = total / counts_smem[b].astype(jnp.float32)
        elif reduction != 'sum':
            raise ValueError(reduction)   # 'none' has no scalar meaning here
        if loss_type == 'FocalLoss':
            total = total * scale
        # Lane-dense (1, 128) row -> unmasked store.
        loss_ref[0] = jnp.broadcast_to(total, loss_ref.shape[1:])


# ---------------------------------------------------------------------------
# Config + host-side stacking (done ONCE, cached) + evaluator wrapper
# ---------------------------------------------------------------------------

class LossCfg:
    loss_type = 'FocalLoss'
    reduction = 'mean'
    alpha = 0.25
    gamma = 2.0
    scale = 1.0


def stack_val_loader(val_loader, tile_n=DEFAULT_TILE_N):
    """Stack/pad the whole val set once; reuse the result across eval calls.

    feats are stored TRANSPOSED -> (B, D, N_pad) with samples on the minor
    (lane) axis, and in bf16 to halve HBM traffic (upcast inside the kernel).
    """
    batch_sizes = [int(dd['labels'].shape[0]) for dd in val_loader]
    num_b = len(val_loader)
    max_n = max(batch_sizes)
    n_pad = _round_up(max_n, LANE)
    if n_pad <= tile_n:
        tile_n = n_pad
    else:
        n_pad = _round_up(n_pad, tile_n)

    feats = jnp.stack([
        jnp.pad(dd['feats'].astype(jnp.float32), ((0, n_pad - n), (0, 0))).T
        for dd, n in zip(val_loader, batch_sizes)]).astype(jnp.bfloat16)  # (B,D,N_pad)
    labels = jnp.stack([
        jnp.pad(dd['labels'].astype(jnp.float32).reshape(-1), (0, n_pad - n))
        for dd, n in zip(val_loader, batch_sizes)]).reshape(num_b, 1, n_pad)
    counts = jnp.asarray(batch_sizes, jnp.int32)                          # (B,)
    return {'feats': feats, 'labels': labels, 'counts': counts, 'tile_n': tile_n}


def evaluator_forward(cfg, params, val_data):
    """Mirrors Evaluator.forward: mean of per-batch losses + AUROC over samples."""
    if isinstance(val_data, (list, tuple)):
        val_data = stack_val_loader(val_data)   # prefer passing the cached dict
    feats, labels, counts = val_data['feats'], val_data['labels'], val_data['counts']
    tn = val_data['tile_n']
    num_b, d, n_pad = feats.shape

    w, b = params                                  # w: (D, 1), b: (1,)
    w3 = w.reshape(1, d, 1).astype(jnp.float32)
    b2 = b.reshape(1, 1).astype(jnp.float32)

    kernel = functools.partial(
        fused_eval_kernel, loss_type=cfg.loss_type, alpha=cfg.alpha,
        gamma=cfg.gamma, scale=cfg.scale, reduction=cfg.reduction)

    logits, per_batch_loss = pl.pallas_call(
        kernel,
        out_shape=(jax.ShapeDtypeStruct((num_b, 1, n_pad), jnp.float32),
                   jax.ShapeDtypeStruct((num_b, 1, LANE), jnp.float32)),
        grid_spec=pltpu.PrefetchScalarGridSpec(
            num_scalar_prefetch=1,
            grid=(num_b, n_pad // tn),
            in_specs=[
                pl.BlockSpec((1, d, tn), lambda bi, j, c: (bi, 0, j)),   # feats
                pl.BlockSpec((1, d, 1), lambda bi, j, c: (0, 0, 0)),     # w
                pl.BlockSpec((1, 1), lambda bi, j, c: (0, 0)),           # bias
                pl.BlockSpec((1, 1, tn), lambda bi, j, c: (bi, 0, j)),   # labels
            ],
            out_specs=(
                pl.BlockSpec((1, 1, tn), lambda bi, j, c: (bi, 0, j)),     # logits
                pl.BlockSpec((1, 1, LANE), lambda bi, j, c: (bi, 0, 0)),   # loss
            ),
            scratch_shapes=[pltpu.VMEM((1, tn), jnp.float32)]),
        compiler_params=pltpu.CompilerParams(
            dimension_semantics=("parallel", "arbitrary"),
            vmem_limit_bytes=32 * 1024 * 1024),
    )(counts, feats, w3, b2, labels)

    val_loss = jnp.mean(per_batch_loss[:, 0, 0])

    # AUROC over padded logits with a validity mask (no per-batch slice/concat).
    logits2d = logits[:, 0, :]
    labels2d = labels[:, 0, :]
    valid = jnp.arange(n_pad, dtype=jnp.int32)[None, :] < counts[:, None]
    val_auc = binary_auroc_masked(logits2d, labels2d, valid)
    return val_loss, val_auc


# ---------------------------------------------------------------------------
# Plain-JAX glue: BinaryAUROC + stand-in score model + loss references
# ---------------------------------------------------------------------------

def binary_auroc_masked(logits, labels, valid):
    # Mann-Whitney U / rank-based AUROC.  Padded entries are pushed to +inf so
    # valid entries get ranks exactly 1..n_valid.
    # TODO(synk): ties get arbitrary ranks (torchmetrics averages them) and the
    # result is NaN if the val set has no positives or no negatives.
    s = jnp.where(valid, logits, jnp.inf).reshape(-1).astype(jnp.float32)
    y = jnp.where(valid, labels, 0.0).reshape(-1).astype(jnp.float32)
    v = valid.reshape(-1).astype(jnp.float32)
    order = jnp.argsort(s)
    ranks = jnp.zeros_like(s).at[order].set(
        jnp.arange(1, s.shape[0] + 1, dtype=jnp.float32))
    n_pos = jnp.sum(y)
    n_neg = jnp.sum(v) - n_pos
    return (jnp.sum(ranks * y) - n_pos * (n_pos + 1) / 2.0) / (n_pos * n_neg)


def score_model_ref(feats, w, b):
    # Deterministic stand-in for geo_model + score_model: (N, D) -> (N, 1).
    # Uses the same bf16-quantized features the kernel reads from HBM.
    return feats.astype(jnp.bfloat16).astype(jnp.float32) @ w + b


def focal_loss_ref(logits, labels, alpha, gamma, scale):
    s = logits.reshape(-1, 1).astype(jnp.float32)
    y = labels.reshape(-1, 1).astype(jnp.float32)
    ce = _bce_with_logits(s, y)
    p = jax.nn.sigmoid(s)
    p_t = p * y + (1 - p) * (1 - y)
    fl = ce * (1 - p_t) ** gamma
    if alpha >= 0:
        fl = (alpha * y + (1 - alpha) * (1 - y)) * fl
    return scale * jnp.mean(fl)


def ce_loss_ref(logits, labels):
    s = logits.reshape(-1, 1).astype(jnp.float32)
    y = labels.reshape(-1, 1).astype(jnp.float32)
    return jnp.mean(_bce_with_logits(s, y))


def l2_loss_ref(logits, labels):
    s = jax.nn.sigmoid(logits.reshape(-1, 1).astype(jnp.float32))
    y = labels.reshape(-1, 1).astype(jnp.float32)
    return jnp.mean((s - y) ** 2)


if __name__ == "__main__":
    cfg = LossCfg()

    D = 32
    batch_sizes = [128, 96, 112]     # ragged on purpose: exercises pad + mask
    key = jax.random.PRNGKey(0)
    kw, kb, *kdata = jax.random.split(key, 2 + 2 * len(batch_sizes))

    # Deterministic "score model" parameters.
    w = jax.random.normal(kw, (D, 1), dtype=jnp.float32) * 0.1
    b = jax.random.normal(kb, (1,), dtype=jnp.float32) * 0.1

    # Synthetic val_loader: list of {feats, labels}.
    val_loader = []
    for i, n in enumerate(batch_sizes):
        feats = jax.random.normal(kdata[2 * i], (n, D), dtype=jnp.float32)
        labels = (jax.random.uniform(kdata[2 * i + 1], (n,)) > 0.5
                  ).astype(jnp.float32)
        val_loader.append({'feats': feats, 'labels': labels})

    # Stack/pad ONCE and reuse across every eval call.
    stacked = stack_val_loader(val_loader)

    # FocalLoss path (default cfg).
    val_loss, val_auc = evaluator_forward(cfg, (w, b), stacked)
    val_loss, val_auc = jax.block_until_ready((val_loss, val_auc))

    ref_losses = [focal_loss_ref(score_model_ref(dd['feats'], w, b), dd['labels'],
                                 cfg.alpha, cfg.gamma, cfg.scale)
                  for dd in val_loader]
    ref_val_loss = jnp.mean(jnp.stack(ref_losses))
    assert jnp.allclose(val_loss, ref_val_loss, rtol=1e-4, atol=1e-6), \
        (float(val_loss), float(ref_val_loss))
    assert 0.0 <= float(val_auc) <= 1.0

    # Also exercise the CEloss / L2loss kernel branches.
    for loss_type, ref_fn in (('CEloss', ce_loss_ref), ('L2loss', l2_loss_ref)):
        cfg2 = LossCfg()
        cfg2.loss_type = loss_type
        vl, _ = evaluator_forward(cfg2, (w, b), stacked)
        vl = jax.block_until_ready(vl)
        ref = jnp.mean(jnp.stack([
            ref_fn(score_model_ref(dd['feats'], w, b), dd['labels'])
            for dd in val_loader]))
        assert jnp.allclose(vl, ref, rtol=1e-4, atol=1e-6), \
            (loss_type, float(vl), float(ref))

    print("KERNEL_OK")
</pallas_src>

<mosaic_0001>
module attributes {stable_mosaic.version = 11 : i64} {
  func.func @fused_eval_kernel(%arg0: i32, %arg1: i32, %arg2: memref<3xi32, #tpu.memory_space<smem>>, %arg3: memref<1x32x128xbf16, #tpu.memory_space<vmem>>, %arg4: memref<1x32x1xf32, #tpu.memory_space<vmem>>, %arg5: memref<1x1xf32, #tpu.memory_space<vmem>>, %arg6: memref<1x1x128xf32, #tpu.memory_space<vmem>>, %arg7: memref<1x1x128xf32, #tpu.memory_space<vmem>>, %arg8: memref<1x1x128xf32, #tpu.memory_space<vmem>>, %arg9: memref<1x128xf32, #tpu.memory_space<vmem>>) attributes {dimension_semantics = [#tpu.dimension_semantics<parallel>, #tpu.dimension_semantics<arbitrary>], iteration_bounds = array<i64: 3, 1>, scalar_prefetch = 1 : i64, scratch_operands = 1 : i64, tpu.core_type = #tpu.core_type<tc>, window_params = [{transform_indices = @transform_0, window_bounds = array<i64: 1, 32, 128>}, {pipeline_mode = #tpu.pipeline_mode<synchronous>, transform_indices = @transform_1, window_bounds = array<i64: 1, 32, 1>}, {pipeline_mode = #tpu.pipeline_mode<synchronous>, transform_indices = @transform_2, window_bounds = array<i64: 1, 1>}, {transform_indices = @transform_3, window_bounds = array<i64: 1, 1, 128>}, {transform_indices = @transform_4, window_bounds = array<i64: 1, 1, 128>}, {transform_indices = @transform_5, window_bounds = array<i64: 1, 1, 128>}]} {
    %c0_i32 = arith.constant 0 : i32
    %0 = arith.cmpi eq, %arg1, %c0_i32 : i32
    %1 = arith.extui %0 : i1 to i32
    %c0_i32_0 = arith.constant 0 : i32
    %2 = arith.cmpi ne, %1, %c0_i32_0 : i32
    scf.if %2 {
      %cst_28 = arith.constant 0.000000e+00 : f32
      %61 = vector.broadcast %cst_28 : f32 to vector<1x128xf32>
      %c0_29 = arith.constant 0 : index
      %c0_30 = arith.constant 0 : index
      %62 = vector.load %arg9[%c0_29, %c0_30] : memref<1x128xf32, #tpu.memory_space<vmem>>, vector<1x128xf32>
      tpu.vector_store %arg9[%c0_29, %c0_30], %61 {strides = array<i32>} : memref<1x128xf32, #tpu.memory_space<vmem>>, vector<1x128xf32>,
    } else {
    }
    %c0 = arith.constant 0 : index
    %c0_1 = arith.constant 0 : index
    %c0_2 = arith.constant 0 : index
    %3 = vector.load %arg3[%c0, %c0_1, %c0_2] : memref<1x32x128xbf16, #tpu.memory_space<vmem>>, vector<1x32x128xbf16>
    %4 = vector.shape_cast %3 : vector<1x32x128xbf16> to vector<32x128xbf16>
    %5 = arith.extf %4 : vector<32x128xbf16> to vector<32x128xf32>
    %c0_3 = arith.constant 0 : index
    %c0_4 = arith.constant 0 : index
    %c0_5 = arith.constant 0 : index
    %6 = vector.load %arg4[%c0_3, %c0_4, %c0_5] : memref<1x32x1xf32, #tpu.memory_space<vmem>>, vector<1x32x1xf32>
    %7 = vector.shape_cast %6 : vector<1x32x1xf32> to vector<32x1xf32>
    %8 = vector.broadcast %7 : vector<32x1xf32> to vector<32x128xf32>
    %9 = arith.mulf %5, %8 : vector<32x128xf32>
    %cst = arith.constant dense<0.000000e+00> : vector<128xf32>
    %10 = vector.multi_reduction <add>, %9, %cst [0] : vector<32x128xf32> to vector<128xf32>
    %11 = vector.shape_cast %10 : vector<128xf32> to vector<1x128xf32>
    %c0_6 = arith.constant 0 : index
    %c0_7 = arith.constant 0 : index
    %12 = vector.load %arg5[%c0_6, %c0_7] : memref<1x1xf32, #tpu.memory_space<vmem>>, vector<1x1xf32>
    %13 = vector.broadcast %12 : vector<1x1xf32> to vector<1x128xf32>
    %14 = arith.addf %11, %13 : vector<1x128xf32>
    %c0_8 = arith.constant 0 : index
    %c0_9 = arith.constant 0 : index
    %c0_10 = arith.constant 0 : index
    %15 = vector.load %arg7[%c0_8, %c0_9, %c0_10] : memref<1x1x128xf32, #tpu.memory_space<vmem>>, vector<1x1x128xf32>
    %16 = vector.shape_cast %15 : vector<1x1x128xf32> to vector<1x128xf32>
    %17 = vector.shape_cast %14 : vector<1x128xf32> to vector<1x1x128xf32>
    tpu.vector_store %arg7[%c0_8, %c0_9, %c0_10], %17 {strides = array<i32>} : memref<1x1x128xf32, #tpu.memory_space<vmem>>, vector<1x1x128xf32>,
    %c0_11 = arith.constant 0 : index
    %c0_12 = arith.constant 0 : index
    %c0_13 = arith.constant 0 : index
    %18 = vector.load %arg6[%c0_11, %c0_12, %c0_13] : memref<1x1x128xf32, #tpu.memory_space<vmem>>, vector<1x1x128xf32>
    %19 = vector.shape_cast %18 : vector<1x1x128xf32> to vector<1x128xf32>
    %cst_14 = arith.constant 0.000000e+00 : f32
    %20 = vector.broadcast %cst_14 : f32 to vector<1x128xf32>
    %21 = arith.maximumf %14, %20 : vector<1x128xf32>
    %22 = arith.mulf %14, %19 : vector<1x128xf32>
    %23 = arith.subf %21, %22 : vector<1x128xf32>
    %24 = math.absf %14 : vector<1x128xf32>
    %cst_15 = arith.constant 0.000000e+00 : f32
    %25 = vector.broadcast %cst_15 : f32 to vector<1x128xf32>
    %26 = arith.subf %25, %24 : vector<1x128xf32>
    %27 = math.exp %26 : vector<1x128xf32>
    %28 = math.log1p %27 : vector<1x128xf32>
    %29 = arith.addf %23, %28 : vector<1x128xf32>
    %cst_16 = arith.constant 0.000000e+00 : f32
    %30 = vector.broadcast %cst_16 : f32 to vector<1x128xf32>
    %31 = arith.subf %30, %29 : vector<1x128xf32>
    %32 = math.exp %31 : vector<1x128xf32>
    %cst_17 = arith.constant 1.000000e+00 : f32
    %33 = vector.broadcast %cst_17 : f32 to vector<1x128xf32>
    %34 = arith.subf %33, %32 : vector<1x128xf32>
    %35 = arith.mulf %34, %34 : vector<1x128xf32>
    %36 = arith.mulf %29, %35 : vector<1x128xf32>
    %cst_18 = arith.constant 2.500000e-01 : f32
    %37 = vector.broadcast %cst_18 : f32 to vector<1x128xf32>
    %38 = arith.mulf %37, %19 : vector<1x128xf32>
    %cst_19 = arith.constant 1.000000e+00 : f32
    %39 = vector.broadcast %cst_19 : f32 to vector<1x128xf32>
    %40 = arith.subf %39, %19 : vector<1x128xf32>
    %cst_20 = arith.constant 7.500000e-01 : f32
    %41 = vector.broadcast %cst_20 : f32 to vector<1x128xf32>
    %42 = arith.mulf %41, %40 : vector<1x128xf32>
    %43 = arith.addf %38, %42 : vector<1x128xf32>
    %44 = arith.mulf %43, %36 : vector<1x128xf32>
    %c128_i32 = arith.constant 128 : i32
    %45 = arith.muli %arg1, %c128_i32 : i32
    %46 = tpu.iota {dimensions = array<i32: 1>} : vector<1x128xi32>
    %47 = vector.broadcast %45 : i32 to vector<1x128xi32>
    %48 = arith.addi %47, %46 : vector<1x128xi32>
    %49 = arith.index_cast %arg0 : i32 to index
    %50 = memref.load %arg2[%49] : memref<3xi32, #tpu.memory_space<smem>>
    %51 = vector.broadcast %50 : i32 to vector<1x128xi32>
    %52 = arith.cmpi slt, %48, %51 : vector<1x128xi32>
    %c0_21 = arith.constant 0 : index
    %c0_22 = arith.constant 0 : index
    %53 = vector.load %arg9[%c0_21, %c0_22] : memref<1x128xf32, #tpu.memory_space<vmem>>, vector<1x128xf32>
    %cst_23 = arith.constant 0.000000e+00 : f32
    %54 = vector.broadcast %cst_23 : f32 to vector<1x128xf32>
    %55 = arith.select %52, %44, %54 : vector<1x128xi1>, vector<1x128xf32>
    %56 = arith.addf %53, %55 : vector<1x128xf32>
    %c0_24 = arith.constant 0 : index
    %c0_25 = arith.constant 0 : index
    %57 = vector.load %arg9[%c0_24, %c0_25] : memref<1x128xf32, #tpu.memory_space<vmem>>, vector<1x128xf32>
    tpu.vector_store %arg9[%c0_24, %c0_25], %56 {strides = array<i32>} : memref<1x128xf32, #tpu.memory_space<vmem>>, vector<1x128xf32>,
    %c0_i32_26 = arith.constant 0 : i32
    %58 = arith.cmpi eq, %arg1, %c0_i32_26 : i32
    %59 = arith.extui %58 : i1 to i32
    %c0_i32_27 = arith.constant 0 : i32
    %60 = arith.cmpi ne, %59, %c0_i32_27 : i32
    scf.if %60 {
      %c0_28 = arith.constant 0 : index
      %c0_29 = arith.constant 0 : index
      %61 = vector.load %arg9[%c0_28, %c0_29] : memref<1x128xf32, #tpu.memory_space<vmem>>, vector<1x128xf32>
      %cst_30 = arith.constant dense<0.000000e+00> : vector<1xf32>
      %62 = vector.multi_reduction <add>, %61, %cst_30 [1] : vector<1x128xf32> to vector<1xf32>
      %63 = vector.shape_cast %62 : vector<1xf32> to vector<1x1xf32>
      %64 = arith.index_cast %arg0 : i32 to index
      %65 = memref.load %arg2[%64] : memref<3xi32, #tpu.memory_space<smem>>
      %66 = arith.sitofp %65 : i32 to f32
      %67 = vector.broadcast %66 : f32 to vector<1x1xf32>
      %68 = arith.divf %63, %67 : vector<1x1xf32>
      %cst_31 = arith.constant 1.000000e+00 : f32
      %69 = vector.broadcast %cst_31 : f32 to vector<1x1xf32>
      %70 = arith.mulf %68, %69 : vector<1x1xf32>
      %71 = vector.shape_cast %70 : vector<1x1xf32> to vector<1x1xf32>
      %72 = vector.broadcast %71 : vector<1x1xf32> to vector<1x128xf32>
      %c0_32 = arith.constant 0 : index
      %c0_33 = arith.constant 0 : index
      %c0_34 = arith.constant 0 : index
      %73 = vector.load %arg8[%c0_32, %c0_33, %c0_34] : memref<1x1x128xf32, #tpu.memory_space<vmem>>, vector<1x1x128xf32>
      %74 = vector.shape_cast %73 : vector<1x1x128xf32> to vector<1x128xf32>
      %75 = vector.shape_cast %72 : vector<1x128xf32> to vector<1x1x128xf32>
      tpu.vector_store %arg8[%c0_32, %c0_33, %c0_34], %75 {strides = array<i32>} : memref<1x1x128xf32, #tpu.memory_space<vmem>>, vector<1x1x128xf32>,
    } else {
    }
    return
  }
  func.func @transform_0(%arg0: i32, %arg1: i32, %arg2: memref<3xi32, #tpu.memory_space<smem>>) -> (i32, i32, i32) {
    %c0_i32 = arith.constant 0 : i32
    %c0_i32_0 = arith.constant 0 : i32
    return %arg0, %c0_i32, %arg1 : i32, i32, i32
  }
  func.func @transform_1(%arg0: i32, %arg1: i32, %arg2: memref<3xi32, #tpu.memory_space<smem>>) -> (i32, i32, i32) {
    %c0_i32 = arith.constant 0 : i32
    %c0_i32_0 = arith.constant 0 : i32
    %c0_i32_1 = arith.constant 0 : i32
    %c0_i32_2 = arith.constant 0 : i32
    return %c0_i32, %c0_i32_0, %c0_i32_1 : i32, i32, i32
  }
  func.func @transform_2(%arg0: i32, %arg1: i32, %arg2: memref<3xi32, #tpu.memory_space<smem>>) -> (i32, i32) {
    %c0_i32 = arith.constant 0 : i32
    %c0_i32_0 = arith.constant 0 : i32
    %c0_i32_1 = arith.constant 0 : i32
    return %c0_i32, %c0_i32_0 : i32, i32
  }
  func.func @transform_3(%arg0: i32, %arg1: i32, %arg2: memref<3xi32, #tpu.memory_space<smem>>) -> (i32, i32, i32) {
    %c0_i32 = arith.constant 0 : i32
    %c0_i32_0 = arith.constant 0 : i32
    return %arg0, %c0_i32, %arg1 : i32, i32, i32
  }
  func.func @transform_4(%arg0: i32, %arg1: i32, %arg2: memref<3xi32, #tpu.memory_space<smem>>) -> (i32, i32, i32) {
    %c0_i32 = arith.constant 0 : i32
    %c0_i32_0 = arith.constant 0 : i32
    return %arg0, %c0_i32, %arg1 : i32, i32, i32
  }
  func.func @transform_5(%arg0: i32, %arg1: i32, %arg2: memref<3xi32, #tpu.memory_space<smem>>) -> (i32, i32, i32) {
    %c0_i32 = arith.constant 0 : i32
    %c0_i32_0 = arith.constant 0 : i32
    %c0_i32_1 = arith.constant 0 : i32
    return %arg0, %c0_i32, %c0_i32_0 : i32, i32, i32
  }
}

</mosaic_0001>

<bundles_post_ra>
// kernel: tpu_custom_call.1
= control target key start
LH: loop header
LB: loop body
LE: loop exit
PB: predicated region body
PF: predicated region fallthrough
CT: control target
= control target key end

     0   :  { %s846_s26 = smov [#allocation4]   ;;  %s1050_s0 = inlined_call_operand.vmem [shape: s32[3], index: 0, kind: input, shape index: {}]   ;;  %s1051_s1 = inlined_call_operand.hbm [shape: bf16[3,32,128], index: 1, kind: input, shape index: {}]   ;;  %s1052_s2 = inlined_call_operand.vmem [shape: f32[1,32,1], index: 2, kind: input, shape index: {}]   ;;  %s1053_s4 = inlined_call_operand.vmem [shape: f32[3,1,128], index: 4, kind: input, shape index: {}]   ;;  %s1054_s5 = inlined_call_operand.hbm [shape: f32[3,1,128], index: 5, kind: output, shape index: {0}]   ;;  %s1055_s6 = inlined_call_operand.hbm [shape: f32[3,1,128], index: 6, kind: output, shape index: {1}]   ;;  %s1056_s3 = inlined_call_operand.<no memory space> [shape: f32[1,1], index: 3, kind: input, shape index: {}]  }
   0x1   :  { %s13_s23 = sshll.u32 %s1050_s0, 4  ;;  %v17_v0 = vstv %s1056_s3  ;;  %s14_s23 = int_to_ptr.vmem [resolvable:$true] %s13_s23 }
   0x2   :  { %18 = vst [vmem:[#allocation5] sm:$0x1] %v17_v0  ;;  %16 = dma.vmem_to_smem %s14_s23, 16, %s846_s26, [#allocation3] }
   0x3   :  { %808 = dma.done.wait [#allocation3], 16 }
   0x4   :  { %809 = vsyncadd [#allocation3], 4294967280 }
   0x5   :  { %21 = sfence }
   0x6   :  { %22 = vsyncpa [#allocation7], 0 }
   0x7   :  { %24 = vsyncpa [#allocation7 + $0x1], 0 }
   0x8   :  { %25 = vsyncpa [#allocation8], 0 }
   0x9   :  { %27 = vsyncpa [#allocation8 + $0x1], 0 }
   0xa   :  { %28 = vsyncpa [#allocation11], 0 }
   0xb   :  { %30 = vsyncpa [#allocation11 + $0x1], 0  ;;  %s892_s27 = smov 0   ;;  %s894_s0 = smov 0  }
   0xc   :  { %s896_s28 = smov 0   ;;  %s898_s3 = smov 0  }
   0xd   :  { %s900_s29 = smov 0   ;;  %s902_s30 = smov 0  }
   0xe LB: > { %s582_s7 = sadd.s32 4294967295, %s844_s30   ;;  %s583_s8 = sadd.s32 4294967294, %s844_s30   ;;  %s844_s30 = sphi %s902_s30, %s36_s30   ;;  %s840_s29 = sphi %s900_s29, %s1065_s29   ;;  %s836_s3 = sphi %s898_s3, %s1064_s3   ;;  %s832_s28 = sphi %s896_s28, %s1063_s28   ;;  %s828_s0 = sphi %s894_s0, %s1062_s0   ;;  %s824_s27 = sphi %s892_s27, %s1061_s27  }
   0xf   : > { %s48_s9 = sadd.s32 1, %s840_s29  ;;  %s57_s10 = sadd.s32 1, %s832_s28 }
  0x10   : > { %p50_p0 = scmp.ge.s32.totalorder %s48_s9, 3  ;;  %p64_p1 = scmp.ne.s32.totalorder %s832_s28, %s828_s0 }
  0x11   : > { %p65_p2 = scmp.eq.s32.totalorder %s844_s30, 0  ;;  %p70_p3 = scmp.ne.s32.totalorder %s828_s0, %s824_s27 }
  0x12   : > { %s1067_s9 = smov (%p50_p0, %s48_s9), 0  ;;  %p71_p5 = scmp.eq.s32.totalorder %s582_s7, 0 }
  0x13   : > { %p933_p4 = por %p65_p2, %p64_p1  ;;  %s52_s12 = ssub.s32 %s840_s29, %s1067_s9 }
  0x14   : > { %p166_p6 = scmp.eq.s32.totalorder %s582_s7, 2  ;;  %p55_p7 = scmp.eq.s32.totalorder %s52_s12, 0 }
  0x15   : > { %p939_p8 = por %p71_p5, %p70_p3  ;;  %p172_p10 = scmp.eq.s32.totalorder %s583_s8, 2 }
  0x16   : > { %p943_p9 = por %p166_p6, %p64_p1  ;;  %p620_p12 = scmp.lt.s32.totalorder %s844_s30, 3 }
  0x17   : > { %s948_s15 = scalar_select %p55_p7, %s832_s28, %s57_s10  }
  0x18   : > { %p950_p11 = por %p172_p10, %p70_p3  ;;  %s224_s17 = sand.u32 1, %s832_s28  }
  0x19   : > { %s586_s18 = sshll.u32 %s224_s17, 4  ;;  %s593_s19 = sshll.u32 %s840_s29, 4 }
  0x1a   : > { %s234_s22 = scalar_lea.hbm %s1051_s1, %s593_s19  ;;  %s228_s23 = scalar_lea.vmem [#allocation6], %s586_s18 }
  0x1b   : > { %s237_s24 = sshll.u32 %s228_s23, 4  ;;  %s235_s25 = sshll.u32 %s234_s22, 4  ;;  %s238_s24 = int_to_ptr.vmem [resolvable:$true] %s237_s24  ;;  %s236_s25 = int_to_ptr.hbm [resolvable:$true] %s235_s25 }
  0x1c   : > { %p610_p13 = pnand %p620_p12, %p933_p4  ;;  %p589_p0 = scmp.ge.s32.totalorder %s844_s30, 1 }
  0x1d   : > { %s225_s26 = scalar_lea.sflag [#allocation7], %s224_s17  ;;  %s847_s7 = smov 64  }
  0x1e   : > { %s848_s8 = smov 4   ;;  %p254_p1 = scmp.lt.s32.totalorder %s844_s30, 4 }
  0x1f   : > { %612 = dma.hbm_to_vmem [thread:$0]  (!%p610_p13), %s236_s25, 256, %s238_s24, %s225_s26, %s847_s7, %s847_s7, %s848_s8  }
  0x20   : > { %p255_p2 = pnand %p589_p0, %p254_p1 }
  0x21   : > { %s965_s10 = sand.u32 (!%p255_p2), 1, %s828_s0  }
  0x22   : > { %258 = sbr.rel (%p255_p2) target bundleno = 367 (0x16f), region = 36  ;;  %s590_s12 = sshll.u32 (!%p255_p2), %s965_s10, 4 }
  0x23   : > { %s261_s18 = scalar_lea.sflag (!%p255_p2), [#allocation7], %s965_s10  ;;  %s264_s19 = scalar_lea.vmem (!%p255_p2), [#allocation6], %s590_s12 }
  0x27   : > { %811 = dma.done.wait (%p939_p8), %s261_s18, 256  }
  0x28   : > { %813 = vsyncadd (%p939_p8), %s261_s18, 4294967040  ;;  %v849_v1 = vmov 0   ;;  %v322_v2 = vld [vmem:[%s1052_s2 + $0x10] sm:$0xff]  ;;  %v320_v3 = vld [vmem:[%s1052_s2] sm:$0xff]  ;;  %v850_v7 = vmov 0.0   ;;  %s294_s25 = scalar_lea.vmem [#allocation9], %s965_s10  ;;  %v396_v54 = vlaneseq  ;;  %s448_s17 = scalar_lea.hbm %s1054_s5, %s836_s3 }
  0x29   : > { %676 = vset.pattern.permute.xlu1 %v849_v1  ;;  %675 = vset.pattern.permute.xlu0 %v849_v1  ;;  %v357_v4 = vld [vmem:[#allocation5] sm:$0x1]  ;;  %v323_v5 = vld [vmem:[%s1052_s2 + $0x18] sm:$0xff]  ;;  %v321_v6 = vld [vmem:[%s1052_s2 + $0x8] sm:$0xff]  ;;  %311 = vst [vmem:[#allocation2] sm:$0x1] %v850_v7 }
  0x2a   : > { %677 = vset.pattern.permute.xlu2 %v849_v1  ;;  %336 = vperm.xlu1 %676, %v322_v2   ;;  %v595_v10 = vld [vmem:[%s264_s19] sm:$0xff]   ;;  %v602_v11 = vld [vmem:[%s264_s19 + $0x8] sm:$0xff]   ;;  %p301_p3 = scmp.lt.s32.totalorder %s836_s3, 2  ;;  %s400_s18 = sld [smem:[#allocation4 + %s836_s3]]  ;;  %v397_v59 = vand.u32 127, %v396_v54 }
  0x2b   : > { %326 = vperm.xlu0 %675, %v320_v3   ;;  %360 = vperm.xlu2 %677, %v357_v4   ;;  %v596_v12 = vunpack.c.l.bf16 %v595_v10  ;;  %v597_v13 = vunpack.c.h.bf16 %v595_v10  ;;  %v600_v14 = vunpack.c.l.bf16 %v602_v11  ;;  %v601_v17 = vunpack.c.h.bf16 %v602_v11  ;;  %s450_s20 = sshll.u32 %s294_s25, 4  ;;  %s452_s21 = sshll.u32 %s448_s17, 4  ;;  %s451_s20 = int_to_ptr.vmem [resolvable:$true] %s450_s20  ;;  %s453_s21 = int_to_ptr.hbm [resolvable:$true] %s452_s21 }
  0x2c   : > { %s302_s26 = scalar_select %p301_p3, %s836_s3, 2 }
  0x2d   : > { %s435_s22 = scalar_lea.sflag [#allocation8], %s965_s10  ;;  %s742_s23 = sshra.s32 %s453_s21, 4  ;;  %s743_s23 = int_to_ptr.hbm [resolvable:$true] %s742_s23 }
  0x2e   : > { %s306_s12 = scalar_lea.vmem %s1053_s4, %s302_s26  ;;  %s744_s13 = scalar_lea.hbm %s743_s23, 1 }
  0x2f   : > { %v366_v40 = vld [vmem:[%s306_s12] sm:$0x1]  ;;  %p745_p4 = scmp.ne.s32.totalorder %s743_s23, %s744_s13  ;;  %s748_s7 = scalar_lea.hbm %s1054_s5, 3 }
  0x30   : > { %v391_v53 = vsub.f32 1.0, %v366_v40  ;;  %v390_v55 = vmul.f32 0.25, %v366_v40  ;;  %v401_v61 = vstv %s400_s18  ;;  %v403_v1 = vld [vmem:[#allocation2] sm:$0x1]  ;;  %p749_p7 = scmp.lt.s32.totalorder %s743_s23, %s1054_s5  ;;  %p750_p8 = scmp.lt.s32.totalorder %s748_s7, %s744_s13 }
  0x31   : > { %vm402_vm1 = vcmp.lt.s32.totalorder %v397_v59, %v401_v61  ;;  %p746_p5 = pnand %p745_p4, %p943_p9 }
  0x32   : > { %341 = vperm.xlu1 %676, %v323_v5   ;;  %v392_v56 = vmul.f32 0.75, %v391_v53  ;;  %p751_p10 = por %p750_p8, %p749_p7 }
  0x33   : > { %331 = vperm.xlu0 %675, %v321_v6   ;;  %p747_p6 = pneg %p746_p5 }
  0x34   : > { %v393_v60 = vadd.f32 %v392_v56, %v390_v55 }
  0x35   : > { %p752_p12 = pnand %p751_p10, %p747_p6 }
  0x85   : > { %v361_v28 = vpop.permute.xlu2 %360 }
  0x86   : > { %v363_v31 = vperm.slane %v361_v28, 0 }
  0x9c   : > { %v337_v8 = vpop.permute.xlu1 %336 }
  0x9d   : > { %v327_v9 = vpop.permute.xlu0 %326  ;;  %v346_v20 = vmul.f32 %v600_v14, %v337_v8 }
  0x9e   : > { %v344_v16 = vmul.f32 %v596_v12, %v327_v9 }
  0xa4   : > { %v342_v19 = vpop.permute.xlu1 %341 }
  0xa5   : > { %v332_v15 = vpop.permute.xlu0 %331  ;;  %v347_v22 = vmul.f32 %v601_v17, %v342_v19 }
  0xa6   : > { %v345_v18 = vmul.f32 %v597_v13, %v332_v15 }
  0xa8   : > { %v348_v21 = vadd.f32 %v345_v18, %v344_v16 }
  0xaa   : > { %v349_v23 = vadd.f32 %v348_v21, %v346_v20 }
  0xac   : > { %v350_v24 = vadd.f32 %v349_v23, %v347_v22 }
  0xae   : > { %v351_v25 = vrot.slane %v350_v24, 4 }
  0xb0   : > { %v352_v26 = vadd.f32 %v351_v25, %v350_v24 }
  0xb2   : > { %v353_v27 = vrot.slane %v352_v26, 2 }
  0xb4   : > { %v354_v29 = vadd.f32 %v353_v27, %v352_v26 }
  0xb6   : > { %v355_v30 = vrot.slane %v354_v29, 1 }
  0xb8   : > { %v356_v32 = vadd.f32 %v355_v30, %v354_v29 }
  0xba   : > { %v364_v33 = vadd.f32 %v363_v31, %v356_v32 }
  0xbc   : > { %v370_v34 = vand.u32 2147483647, %v364_v33  ;;  %365 = vst [vmem:[%s294_s25] sm:$0x1] %v364_v33  ;;  %v367_v42 = vmax.f32 %v364_v33, 0.0  ;;  %v368_v43 = vmul.f32 %v366_v40, %v364_v33 }
  0xbe   : > { %v371_v35 = vsub.f32 0.0, %v370_v34  ;;  %v369_v48 = vsub.f32 %v367_v42, %v368_v43 }
  0xc0   : > { %v372_v36 = vmul.f32 1.442695, %v371_v35 }
  0xc2   : > { %678 = vpow2.f32 %v372_v36 }
  0xc8   : > { %v679_v37 = vpop.eup %678 }
  0xc9   : > { %v374_v38 = vadd.f32 1.0, %v679_v37  ;;  %v377_v39 = vmul.f32 -0.5, %v679_v37  ;;  %v380_v44 = vand.u32 2147483647, %v679_v37 }
  0xcb   : > { %680 = vlog2.f32 %v374_v38  ;;  %v378_v41 = vadd.f32 1.0, %v377_v39  ;;  %vm381_vm0 = vcmp.lt.f32.partialorder %v380_v44, 0.0004427343 }
  0xcd   : > { %v379_v47 = vmul.f32 %v679_v37, %v378_v41 }
  0xd1   : > { %v681_v45 = vpop.eup %680 }
  0xd2   : > { %v376_v46 = vmul.f32 0.6931472, %v681_v45 }
  0xd4   : > { %v382_v49 = vsel %vm381_vm0, %v379_v47, %v376_v46 }
  0xd5   : > { %v383_v50 = vadd.f32 %v382_v49, %v369_v48 }
  0xd7   : > { %v384_v51 = vsub.f32 0.0, %v383_v50 }
  0xd9   : > { %v385_v52 = vmul.f32 1.442695, %v384_v51 }
  0xdb   : > { %682 = vpow2.f32 %v385_v52 }
  0xe1   : > { %v683_v57 = vpop.eup %682 }
  0xe2   : > { %v387_v58 = vsub.f32 1.0, %v683_v57 }
  0xe4   : > { %v388_v62 = vmul.f32 %v387_v58, %v387_v58 }
  0xe6   : > { %v389_v63 = vmul.f32 %v388_v62, %v383_v50 }
  0xe8   : > { %v394_v0 = vmul.f32 %v393_v60, %v389_v63 }
  0xea   : > { %v404_v2 = vsel %vm402_vm1, %v394_v0, 0.0 }
  0xeb   : > { %v405_v3 = vadd.f32 %v404_v2, %v403_v1 }
  0xed   : > { %406 = vst [vmem:[#allocation2] sm:$0x1] %v405_v3 }
  0xee   : > { %755 = shalt.err (!%p752_p12)
}
  0xef   : > { %605 = dma.vmem_to_hbm [thread:$0]  (%p943_p9), %s451_s20, 16, %s453_s21, %s435_s22   ;;  %vm411_vm2 = vcmask 1040384  }
  0xf0   : > { %s415_s25 = sld [smem:[#allocation4 + %s836_s3]]  ;;  %s461_s17 = scalar_lea.hbm %s1055_s6, %s836_s3 }
  0xf1   : > { %s300_s20 = scalar_lea.vmem [#allocation10], %s965_s10  ;;  %s465_s22 = sshll.u32 %s461_s17, 4  ;;  %s466_s22 = int_to_ptr.hbm [resolvable:$true] %s465_s22 }
  0xf2   : > { %s463_s21 = sshll.u32 %s300_s20, 4  ;;  %s439_s23 = scalar_lea.sflag [#allocation11], %s965_s10  ;;  %s464_s21 = int_to_ptr.vmem [resolvable:$true] %s463_s21 }
  0xf3   : > { %s770_s13 = sshra.s32 %s466_s22, 4  ;;  %s776_s3 = scalar_lea.hbm %s1055_s6, 3  ;;  %s771_s13 = int_to_ptr.hbm [resolvable:$true] %s770_s13 }
  0xf4   : > { %v410_v4 = vld [vmem:[#allocation2] sm:$0x1]  ;;  %s772_s24 = scalar_lea.hbm %s771_s13, 1  ;;  %p777_p2 = scmp.lt.s32.totalorder %s771_s13, %s1055_s6 }
  0xf5   : > { %v412_v5 = vsel %vm411_vm2, %v410_v4, 0.0  ;;  %p773_p13 = scmp.ne.s32.totalorder %s771_s13, %s772_s24  ;;  %p778_p3 = scmp.lt.s32.totalorder %s776_s3, %s772_s24 }
  0xf6   : > { %413 = vadd.xlane.f32.xlu2 %v412_v5  ;;  %s416_s18 = scvt.s32.f32 %s415_s25 }
  0xf7   : > { %p774_p0 = pnand %p773_p13, %p943_p9  ;;  %p779_p4 = por %p778_p3, %p777_p2 }
  0xf8   : > { %v417_v6 = vstv %s416_s18 }
  0xf9   : > { %684 = vrcp.f32 %v417_v6  ;;  %vm423_vm3 = vweird.f32 %v417_v6  ;;  %v429_v11 = vand.u32 2147483648, %v417_v6  ;;  %v427_v13 = vand.u32 2147483647, %v417_v6  ;;  %p775_p1 = pneg %p774_p0 }
  0xfb   : > { %v430_v14 = vor.u32 1.1754944e-38, %v429_v11  ;;  %vm428_vm6 = vcmp.eq.f32.partialorder %v427_v13, 8.507059e+37  ;;  %p780_p5 = pnand %p779_p4, %p775_p1 }
  0xff   : > { %v685_v7 = vpop.eup %684 }
 0x100   : > { %v419_v8 = vmul.f32 %v685_v7, %v417_v6  ;;  %vm424_vm4 = vweird.f32 %v685_v7 }
 0x101   : > { %vm425_vm5 = vmor %vm423_vm3, %vm424_vm4 }
 0x102   : > { %v420_v9 = vsub.f32 1.0, %v419_v8 }
 0x104   : > { %v421_v10 = vmul.f32 %v685_v7, %v420_v9 }
 0x106   : > { %v422_v12 = vadd.f32 %v685_v7, %v421_v10 }
 0x108   : > { %v426_v15 = vsel %vm425_vm5, %v685_v7, %v422_v12 }
 0x109   : > { %v431_v16 = vsel %vm428_vm6, %v430_v14, %v426_v15 }
 0x169   : > { %v414_v17 = vpop.xlane.xlu2 %413 }
 0x16a   : > { %v432_v18 = vmul.f32 %v431_v16, %v414_v17 }
 0x16c   : > { %433 = vst [vmem:[%s300_s20] sm:$0x1] %v432_v18 }
 0x16d   : > { %783 = shalt.err (!%p780_p5)
}
 0x16e   : > { %606 = dma.vmem_to_hbm [thread:$0]  (%p943_p9), %s464_s21, 16, %s466_s22, %s439_s23  }
 0x16f PF: > { %p621_p6 = scmp.ge.s32.totalorder %s844_s30, 2  ;;  %s477_s10 = sand.u32 1, %s824_s27  }
 0x170   : > { %s478_s25 = scalar_lea.sflag [#allocation8], %s477_s10 }
 0x171   : > { %p614_p7 = pnand %p621_p6, %p950_p11 }
 0x173   : > { %p615_p8 = pneg %p614_p7 }
 0x175   : > { %815 = dma.done.wait (%p615_p8), %s478_s25, 16  }
 0x176   : > { %817 = vsyncadd (%p615_p8), %s478_s25, 4294967280  ;;  %s487_s18 = scalar_lea.sflag [#allocation11], %s477_s10 }
 0x177   : > { %819 = dma.done.wait (%p615_p8), %s487_s18, 16  }
 0x178   : > { %821 = vsyncadd (%p615_p8), %s487_s18, 4294967280  ;;  %s36_s30 = sadd.s32 1, %s844_s30   ;;  %s1061_s27 = smov %s828_s0 }
 0x179   : > { %p33_p10 = scmp.ge.s32.totalorder %s36_s30, 5   ;;  %s1062_s0 = smov %s832_s28 }
 0x17a   : > { %s1063_s28 = smov %s948_s15  ;;  %s1064_s3 = smov %s840_s29 }
 0x17b   : > { %s1065_s29 = smov %s1067_s9  ;;  %35 = sbr.rel (!%p33_p10) target bundleno = 14 (0xe), region = 109 }
 0x180   :  { %492 = vsyncpa [#allocation7], 1 }
 0x181   :  { %494 = vsyncpa [#allocation7 + $0x1], 1 }
 0x182   :  { %495 = vsyncpa [#allocation8], 1 }
 0x183   :  { %497 = vsyncpa [#allocation8 + $0x1], 1 }
 0x184   :  { %498 = vsyncpa [#allocation11], 1 }
 0x185   :  { %500 = vsyncpa [#allocation11 + $0x1], 1 }

</bundles_post_ra>
